<compile_context>
chip_gen: v5e
topology: v5e:2x2
jax: 0.10.0
libtpu: 0.0.40
codegen_flags: <defaults>
</compile_context>

<pallas_src>
import functools
import math

import jax
import jax.numpy as jnp
from jax.experimental import pallas as pl
from jax.experimental.pallas import tpu as pltpu


def _round_up(x, m):
    return (x + m - 1) // m * m


# ---------------------------------------------------------------------------
# Kernel
# ---------------------------------------------------------------------------
def actor_kernel(x_ref,
                 w1_ref, b1_ref,
                 w2_ref, b2_ref,
                 w3_ref, b3_ref,
                 wh_ref, bh_ref,
                 out_ref, *, action_dim):
    """One (block_b, ·) batch tile of the Actor MLP.

    head columns: [0, A) = mean, [A, 2A) = log_std, rest = lane padding.
    """
    # Hidden layers: bf16 MXU matmul, f32 accumulation; bias+ReLU in f32 (VPU).
    x = x_ref[...].astype(jnp.bfloat16)
    h = jnp.dot(x, w1_ref[...], preferred_element_type=jnp.float32) + b1_ref[...]
    h = jnp.maximum(h, 0.0)

    h = jnp.dot(h.astype(jnp.bfloat16), w2_ref[...],
                preferred_element_type=jnp.float32) + b2_ref[...]
    h = jnp.maximum(h, 0.0)

    h = jnp.dot(h.astype(jnp.bfloat16), w3_ref[...],
                preferred_element_type=jnp.float32) + b3_ref[...]
    h = jnp.maximum(h, 0.0)

    # Fused head: single MXU pass over the lane-padded [Wm | Ws | 0] weight.
    head = jnp.dot(h.astype(jnp.bfloat16), wh_ref[...],
                   preferred_element_type=jnp.float32) + bh_ref[...]

    # Clamp only the log_std (and don't-care padding) lanes; mean lanes untouched.
    col = jax.lax.broadcasted_iota(jnp.int32, head.shape, dimension=1)
    head = jnp.where(col >= action_dim, jnp.clip(head, -20.0, 2.0), head)

    out_ref[...] = head


# ---------------------------------------------------------------------------
# Batch tiling policy (per perf review)
# ---------------------------------------------------------------------------
_MAX_BLOCK_B = 512    # (512, 256) f32 activation tile is 512 KiB -> VMEM non-issue
_SINGLE_TILE_B = 64   # below this the call is launch/DMA-latency bound; don't split


def _choose_batch_tiling(B):
    """Returns (block_b, padded_B).

    * tiles are multiples of 16 (bf16 sublane packing: 16 rows / vreg),
    * >= 2 grid steps once B is large enough so the "parallel" batch axis can
      shard across v7x's two TensorCores,
    * cdiv-based split (cap 512 rows) keeps zero-row padding small.
    """
    B = max(int(B), 1)
    if B <= _SINGLE_TILE_B:
        block_b = _round_up(B, 16)
        return block_b, block_b
    n_tiles = max(2, pl.cdiv(B, _MAX_BLOCK_B))
    block_b = _round_up(pl.cdiv(B, n_tiles), 16)
    return block_b, block_b * n_tiles


# ---------------------------------------------------------------------------
# Wrapper
# ---------------------------------------------------------------------------
def actor_forward(state, kparams, *, action_dim):
    """state: (B, state_dim) f32. kparams: output of prepare_actor_params()."""
    B, state_dim = state.shape
    state_pad = kparams["w1"].shape[0]   # state_dim rounded up to 128 lanes
    hidden = kparams["w1"].shape[1]
    head_pad = kparams["wh"].shape[1]

    block_b, Bp = _choose_batch_tiling(B)
    # Zero-pad batch rows (sliced off below) and input lanes (matched by zero
    # rows appended to W1) -> lane-dense x tile, unmasked DMA / vld.
    state = jnp.pad(state, ((0, Bp - B), (0, state_pad - state_dim)))
    grid = (Bp // block_b,)

    def full(arr):
        # Whole-array block with a constant index map: stays VMEM-resident
        # across every batch tile.
        return pl.BlockSpec(arr.shape, lambda i: (0,) * arr.ndim)

    kernel = functools.partial(actor_kernel, action_dim=action_dim)

    weight_bytes = sum(int(kparams[k].size) * kparams[k].dtype.itemsize
                       for k in ("w1", "b1", "w2", "b2", "w3", "b3", "wh", "bh"))
    cost = pl.CostEstimate(
        flops=2 * Bp * (state_pad * hidden + 2 * hidden * hidden + hidden * head_pad),
        transcendentals=0,
        bytes_accessed=Bp * state_pad * 4 + weight_bytes + Bp * head_pad * 4,
    )

    out = pl.pallas_call(
        kernel,
        out_shape=jax.ShapeDtypeStruct((Bp, head_pad), jnp.float32),
        grid=grid,
        in_specs=[
            pl.BlockSpec((block_b, state_pad), lambda i: (i, 0)),
            full(kparams["w1"]), full(kparams["b1"]),
            full(kparams["w2"]), full(kparams["b2"]),
            full(kparams["w3"]), full(kparams["b3"]),
            full(kparams["wh"]), full(kparams["bh"]),
        ],
        out_specs=pl.BlockSpec((block_b, head_pad), lambda i: (i, 0)),
        compiler_params=pltpu.CompilerParams(
            dimension_semantics=("parallel",),
            # Explicit scoped-VMEM budget: ~2 MiB of buffers at hidden=256 even
            # with default double-buffering; 32 MiB is safe on v5e/v6e/v7x.
            vmem_limit_bytes=32 * 1024 * 1024,
        ),
        cost_estimate=cost,
    )(state,
      kparams["w1"], kparams["b1"],
      kparams["w2"], kparams["b2"],
      kparams["w3"], kparams["b3"],
      kparams["wh"], kparams["bh"])

    out = out[:B]
    mean = out[:, :action_dim]
    log_std = out[:, action_dim:2 * action_dim]
    return mean, log_std


# ---------------------------------------------------------------------------
# Parameter init / packing
# ---------------------------------------------------------------------------
def xavier_uniform(key, fan_in, fan_out):
    # Matches torch.nn.init.xavier_uniform_ (gain=1): U(-a, a), a = sqrt(6/(fan_in+fan_out))
    a = math.sqrt(6.0 / (fan_in + fan_out))
    return jax.random.uniform(key, (fan_in, fan_out), jnp.float32, minval=-a, maxval=a)


def init_actor_params(key, state_dim, action_dim, hidden_dim):
    """Raw f32 params, laid out (in, out) for x @ W + b (PyTorch stores (out, in))."""
    k1, k2, k3, k4, k5 = jax.random.split(key, 5)
    return {
        "w1": xavier_uniform(k1, state_dim, hidden_dim),
        "b1": jnp.zeros((1, hidden_dim), jnp.float32),
        "w2": xavier_uniform(k2, hidden_dim, hidden_dim),
        "b2": jnp.zeros((1, hidden_dim), jnp.float32),
        "w3": xavier_uniform(k3, hidden_dim, hidden_dim),
        "b3": jnp.zeros((1, hidden_dim), jnp.float32),
        "wm": xavier_uniform(k4, hidden_dim, action_dim),
        "bm": jnp.zeros((1, action_dim), jnp.float32),
        "ws": xavier_uniform(k5, hidden_dim, action_dim),
        "bs": jnp.zeros((1, action_dim), jnp.float32),
    }


def prepare_actor_params(raw):
    """Kernel-ready params: bf16 weights; W1 rows zero-padded to 128 input lanes;
    mean/log_std heads fused ([Wm | Ws | 0]) and lane-padded to a 128 multiple."""
    state_dim, _hidden = raw["w1"].shape
    action_dim = raw["wm"].shape[1]

    state_pad = _round_up(state_dim, 128)
    w1 = jnp.pad(raw["w1"], ((0, state_pad - state_dim), (0, 0)))

    head_pad = max(128, _round_up(2 * action_dim, 128))
    wh = jnp.concatenate([raw["wm"], raw["ws"]], axis=1)
    bh = jnp.concatenate([raw["bm"], raw["bs"]], axis=1)
    pad = head_pad - 2 * action_dim
    wh = jnp.pad(wh, ((0, 0), (0, pad)))
    bh = jnp.pad(bh, ((0, 0), (0, pad)))

    return {
        "w1": w1.astype(jnp.bfloat16),        "b1": raw["b1"],
        "w2": raw["w2"].astype(jnp.bfloat16), "b2": raw["b2"],
        "w3": raw["w3"].astype(jnp.bfloat16), "b3": raw["b3"],
        "wh": wh.astype(jnp.bfloat16),        "bh": bh,
    }


def actor_forward_ref(state, p):
    """Full-f32 reference (matches the PyTorch module exactly)."""
    h = jax.nn.relu(state @ p["w1"] + p["b1"])
    h = jax.nn.relu(h @ p["w2"] + p["b2"])
    h = jax.nn.relu(h @ p["w3"] + p["b3"])
    mean = h @ p["wm"] + p["bm"]
    log_std = jnp.clip(h @ p["ws"] + p["bs"], -20.0, 2.0)
    return mean, log_std


if __name__ == "__main__":
    key = jax.random.PRNGKey(0)
    k_param, k_state = jax.random.split(key)

    state_dim = 16
    action_dim = 8
    hidden_dim = 256  # PyTorch default

    raw_params = init_actor_params(k_param, state_dim, action_dim, hidden_dim)
    kparams = prepare_actor_params(raw_params)

    fwd = jax.jit(actor_forward, static_argnames=("action_dim",))

    # Small inference-style batch: single grid tile (latency-bound regime).
    state_small = jax.random.normal(k_state, (8, state_dim), jnp.float32)
    mean, log_std = fwd(state_small, kparams, action_dim=action_dim)
    jax.block_until_ready((mean, log_std))

    mean_ref, log_std_ref = actor_forward_ref(state_small, raw_params)
    assert mean.shape == (8, action_dim) and log_std.shape == (8, action_dim)
    # Loosened tolerance: kernel uses bf16 matmul operands with f32 accumulation.
    assert jnp.allclose(mean, mean_ref, atol=2e-2, rtol=2e-2)
    assert jnp.allclose(log_std, log_std_ref, atol=2e-2, rtol=2e-2)
    assert bool(jnp.all(log_std <= 2.0)) and bool(jnp.all(log_std >= -20.0))

    # Larger batch: exercises the >=2-tile "parallel" grid path (v7x megacore).
    state_big = jax.random.normal(jax.random.PRNGKey(1), (200, state_dim), jnp.float32)
    mean_b, log_std_b = fwd(state_big, kparams, action_dim=action_dim)
    jax.block_until_ready((mean_b, log_std_b))
    mean_b_ref, log_std_b_ref = actor_forward_ref(state_big, raw_params)
    assert mean_b.shape == (200, action_dim) and log_std_b.shape == (200, action_dim)
    assert jnp.allclose(mean_b, mean_b_ref, atol=3e-2, rtol=3e-2)
    assert jnp.allclose(log_std_b, log_std_b_ref, atol=3e-2, rtol=3e-2)
    assert bool(jnp.all(log_std_b <= 2.0)) and bool(jnp.all(log_std_b >= -20.0))

    print("KERNEL_OK")
</pallas_src>

<mosaic_0001>
module attributes {stable_mosaic.version = 11 : i64} {
  func.func @actor_kernel(%arg0: i32, %arg1: memref<16x128xf32, #tpu.memory_space<vmem>>, %arg2: memref<128x256xbf16, #tpu.memory_space<vmem>>, %arg3: memref<1x256xf32, #tpu.memory_space<vmem>>, %arg4: memref<256x256xbf16, #tpu.memory_space<vmem>>, %arg5: memref<1x256xf32, #tpu.memory_space<vmem>>, %arg6: memref<256x256xbf16, #tpu.memory_space<vmem>>, %arg7: memref<1x256xf32, #tpu.memory_space<vmem>>, %arg8: memref<256x128xbf16, #tpu.memory_space<vmem>>, %arg9: memref<1x128xf32, #tpu.memory_space<vmem>>, %arg10: memref<16x128xf32, #tpu.memory_space<vmem>>) attributes {dimension_semantics = [#tpu.dimension_semantics<parallel>], iteration_bounds = array<i64: 1>, scalar_prefetch = 0 : i64, scratch_operands = 0 : i64, tpu.core_type = #tpu.core_type<tc>, window_params = [{transform_indices = @transform_0, window_bounds = array<i64: 16, 128>}, {pipeline_mode = #tpu.pipeline_mode<synchronous>, transform_indices = @transform_1, window_bounds = array<i64: 128, 256>}, {pipeline_mode = #tpu.pipeline_mode<synchronous>, transform_indices = @transform_2, window_bounds = array<i64: 1, 256>}, {pipeline_mode = #tpu.pipeline_mode<synchronous>, transform_indices = @transform_3, window_bounds = array<i64: 256, 256>}, {pipeline_mode = #tpu.pipeline_mode<synchronous>, transform_indices = @transform_4, window_bounds = array<i64: 1, 256>}, {pipeline_mode = #tpu.pipeline_mode<synchronous>, transform_indices = @transform_5, window_bounds = array<i64: 256, 256>}, {pipeline_mode = #tpu.pipeline_mode<synchronous>, transform_indices = @transform_6, window_bounds = array<i64: 1, 256>}, {pipeline_mode = #tpu.pipeline_mode<synchronous>, transform_indices = @transform_7, window_bounds = array<i64: 256, 128>}, {pipeline_mode = #tpu.pipeline_mode<synchronous>, transform_indices = @transform_8, window_bounds = array<i64: 1, 128>}, {transform_indices = @transform_9, window_bounds = array<i64: 16, 128>}]} {
    %c0 = arith.constant 0 : index
    %c0_0 = arith.constant 0 : index
    %0 = vector.load %arg1[%c0, %c0_0] : memref<16x128xf32, #tpu.memory_space<vmem>>, vector<16x128xf32>
    %1 = arith.truncf %0 : vector<16x128xf32> to vector<16x128xbf16>
    %c0_1 = arith.constant 0 : index
    %c0_2 = arith.constant 0 : index
    %2 = vector.load %arg2[%c0_1, %c0_2] : memref<128x256xbf16, #tpu.memory_space<vmem>>, vector<128x256xbf16>
    %cst = arith.constant dense<0.000000e+00> : vector<16x256xf32>
    %3 = tpu.matmul %1, %2, %cst {dimension_numbers = #tpu.dot_dimension_numbers<[1], [0], [0], [1], [0, 0, 1, 1], [], []>} : vector<16x128xbf16>, vector<128x256xbf16>, vector<16x256xf32> -> vector<16x256xf32>
    %c0_3 = arith.constant 0 : index
    %c0_4 = arith.constant 0 : index
    %4 = vector.load %arg3[%c0_3, %c0_4] : memref<1x256xf32, #tpu.memory_space<vmem>>, vector<1x256xf32>
    %5 = vector.broadcast %4 : vector<1x256xf32> to vector<16x256xf32>
    %6 = arith.addf %3, %5 : vector<16x256xf32>
    %cst_5 = arith.constant 0.000000e+00 : f32
    %7 = vector.broadcast %cst_5 : f32 to vector<16x256xf32>
    %8 = arith.maximumf %6, %7 : vector<16x256xf32>
    %9 = arith.truncf %8 : vector<16x256xf32> to vector<16x256xbf16>
    %c0_6 = arith.constant 0 : index
    %c0_7 = arith.constant 0 : index
    %10 = vector.load %arg4[%c0_6, %c0_7] : memref<256x256xbf16, #tpu.memory_space<vmem>>, vector<256x256xbf16>
    %cst_8 = arith.constant dense<0.000000e+00> : vector<16x256xf32>
    %11 = tpu.matmul %9, %10, %cst_8 {dimension_numbers = #tpu.dot_dimension_numbers<[1], [0], [0], [1], [0, 0, 1, 1], [], []>} : vector<16x256xbf16>, vector<256x256xbf16>, vector<16x256xf32> -> vector<16x256xf32>
    %c0_9 = arith.constant 0 : index
    %c0_10 = arith.constant 0 : index
    %12 = vector.load %arg5[%c0_9, %c0_10] : memref<1x256xf32, #tpu.memory_space<vmem>>, vector<1x256xf32>
    %13 = vector.broadcast %12 : vector<1x256xf32> to vector<16x256xf32>
    %14 = arith.addf %11, %13 : vector<16x256xf32>
    %cst_11 = arith.constant 0.000000e+00 : f32
    %15 = vector.broadcast %cst_11 : f32 to vector<16x256xf32>
    %16 = arith.maximumf %14, %15 : vector<16x256xf32>
    %17 = arith.truncf %16 : vector<16x256xf32> to vector<16x256xbf16>
    %c0_12 = arith.constant 0 : index
    %c0_13 = arith.constant 0 : index
    %18 = vector.load %arg6[%c0_12, %c0_13] : memref<256x256xbf16, #tpu.memory_space<vmem>>, vector<256x256xbf16>
    %cst_14 = arith.constant dense<0.000000e+00> : vector<16x256xf32>
    %19 = tpu.matmul %17, %18, %cst_14 {dimension_numbers = #tpu.dot_dimension_numbers<[1], [0], [0], [1], [0, 0, 1, 1], [], []>} : vector<16x256xbf16>, vector<256x256xbf16>, vector<16x256xf32> -> vector<16x256xf32>
    %c0_15 = arith.constant 0 : index
    %c0_16 = arith.constant 0 : index
    %20 = vector.load %arg7[%c0_15, %c0_16] : memref<1x256xf32, #tpu.memory_space<vmem>>, vector<1x256xf32>
    %21 = vector.broadcast %20 : vector<1x256xf32> to vector<16x256xf32>
    %22 = arith.addf %19, %21 : vector<16x256xf32>
    %cst_17 = arith.constant 0.000000e+00 : f32
    %23 = vector.broadcast %cst_17 : f32 to vector<16x256xf32>
    %24 = arith.maximumf %22, %23 : vector<16x256xf32>
    %25 = arith.truncf %24 : vector<16x256xf32> to vector<16x256xbf16>
    %c0_18 = arith.constant 0 : index
    %c0_19 = arith.constant 0 : index
    %26 = vector.load %arg8[%c0_18, %c0_19] : memref<256x128xbf16, #tpu.memory_space<vmem>>, vector<256x128xbf16>
    %cst_20 = arith.constant dense<0.000000e+00> : vector<16x128xf32>
    %27 = tpu.matmul %25, %26, %cst_20 {dimension_numbers = #tpu.dot_dimension_numbers<[1], [0], [0], [1], [0, 0, 1, 1], [], []>} : vector<16x256xbf16>, vector<256x128xbf16>, vector<16x128xf32> -> vector<16x128xf32>
    %c0_21 = arith.constant 0 : index
    %c0_22 = arith.constant 0 : index
    %28 = vector.load %arg9[%c0_21, %c0_22] : memref<1x128xf32, #tpu.memory_space<vmem>>, vector<1x128xf32>
    %29 = vector.broadcast %28 : vector<1x128xf32> to vector<16x128xf32>
    %30 = arith.addf %27, %29 : vector<16x128xf32>
    %31 = tpu.iota {dimensions = array<i32: 1>} : vector<16x128xi32>
    %c8_i32 = arith.constant 8 : i32
    %32 = vector.broadcast %c8_i32 : i32 to vector<16x128xi32>
    %33 = arith.cmpi sge, %31, %32 : vector<16x128xi32>
    %cst_23 = arith.constant -2.000000e+01 : f32
    %cst_24 = arith.constant 2.000000e+00 : f32
    %34 = vector.broadcast %cst_23 : f32 to vector<16x128xf32>
    %35 = arith.maximumf %34, %30 : vector<16x128xf32>
    %36 = vector.broadcast %cst_24 : f32 to vector<16x128xf32>
    %37 = arith.minimumf %36, %35 : vector<16x128xf32>
    %38 = arith.select %33, %37, %30 : vector<16x128xi1>, vector<16x128xf32>
    %c0_25 = arith.constant 0 : index
    %c0_26 = arith.constant 0 : index
    %39 = vector.load %arg10[%c0_25, %c0_26] : memref<16x128xf32, #tpu.memory_space<vmem>>, vector<16x128xf32>
    tpu.vector_store %arg10[%c0_25, %c0_26], %38 {strides = array<i32>} : memref<16x128xf32, #tpu.memory_space<vmem>>, vector<16x128xf32>,
    return
  }
  func.func @transform_0(%arg0: i32) -> (i32, i32) {
    %c0_i32 = arith.constant 0 : i32
    %c0_i32_0 = arith.constant 0 : i32
    return %arg0, %c0_i32 : i32, i32
  }
  func.func @transform_1(%arg0: i32) -> (i32, i32) {
    %c0_i32 = arith.constant 0 : i32
    %c0_i32_0 = arith.constant 0 : i32
    %c0_i32_1 = arith.constant 0 : i32
    return %c0_i32, %c0_i32_0 : i32, i32
  }
  func.func @transform_2(%arg0: i32) -> (i32, i32) {
    %c0_i32 = arith.constant 0 : i32
    %c0_i32_0 = arith.constant 0 : i32
    %c0_i32_1 = arith.constant 0 : i32
    return %c0_i32, %c0_i32_0 : i32, i32
  }
  func.func @transform_3(%arg0: i32) -> (i32, i32) {
    %c0_i32 = arith.constant 0 : i32
    %c0_i32_0 = arith.constant 0 : i32
    %c0_i32_1 = arith.constant 0 : i32
    return %c0_i32, %c0_i32_0 : i32, i32
  }
  func.func @transform_4(%arg0: i32) -> (i32, i32) {
    %c0_i32 = arith.constant 0 : i32
    %c0_i32_0 = arith.constant 0 : i32
    %c0_i32_1 = arith.constant 0 : i32
    return %c0_i32, %c0_i32_0 : i32, i32
  }
  func.func @transform_5(%arg0: i32) -> (i32, i32) {
    %c0_i32 = arith.constant 0 : i32
    %c0_i32_0 = arith.constant 0 : i32
    %c0_i32_1 = arith.constant 0 : i32
    return %c0_i32, %c0_i32_0 : i32, i32
  }
  func.func @transform_6(%arg0: i32) -> (i32, i32) {
    %c0_i32 = arith.constant 0 : i32
    %c0_i32_0 = arith.constant 0 : i32
    %c0_i32_1 = arith.constant 0 : i32
    return %c0_i32, %c0_i32_0 : i32, i32
  }
  func.func @transform_7(%arg0: i32) -> (i32, i32) {
    %c0_i32 = arith.constant 0 : i32
    %c0_i32_0 = arith.constant 0 : i32
    %c0_i32_1 = arith.constant 0 : i32
    return %c0_i32, %c0_i32_0 : i32, i32
  }
  func.func @transform_8(%arg0: i32) -> (i32, i32) {
    %c0_i32 = arith.constant 0 : i32
    %c0_i32_0 = arith.constant 0 : i32
    %c0_i32_1 = arith.constant 0 : i32
    return %c0_i32, %c0_i32_0 : i32, i32
  }
  func.func @transform_9(%arg0: i32) -> (i32, i32) {
    %c0_i32 = arith.constant 0 : i32
    %c0_i32_0 = arith.constant 0 : i32
    return %arg0, %c0_i32 : i32, i32
  }
}

</mosaic_0001>

<bundles_post_ra>
// kernel: actor_forward.1
= control target key start
LH: loop header
LB: loop body
LE: loop exit
PB: predicated region body
PF: predicated region fallthrough
CT: control target
= control target key end

     0   :  { %14 = vsyncpa [#allocation3], 0  ;;  %s1617_s0 = inlined_call_operand.vmem [shape: f32[16,128], index: 0, kind: input, shape index: {}]   ;;  %s1618_s1 = inlined_call_operand.hbm [shape: bf16[128,256], index: 1, kind: input, shape index: {}]   ;;  %s1619_s2 = inlined_call_operand.vmem [shape: f32[1,256], index: 2, kind: input, shape index: {}]   ;;  %s1620_s3 = inlined_call_operand.hbm [shape: bf16[256,256], index: 3, kind: input, shape index: {}]   ;;  %s1621_s4 = inlined_call_operand.vmem [shape: f32[1,256], index: 4, kind: input, shape index: {}]   ;;  %s1622_s5 = inlined_call_operand.hbm [shape: bf16[256,256], index: 5, kind: input, shape index: {}]   ;;  %s1623_s6 = inlined_call_operand.vmem [shape: f32[1,256], index: 6, kind: input, shape index: {}]   ;;  %s1624_s7 = inlined_call_operand.hbm [shape: bf16[256,128], index: 7, kind: input, shape index: {}]   ;;  %s1625_s8 = inlined_call_operand.vmem [shape: f32[1,128], index: 8, kind: input, shape index: {}]   ;;  %s1626_s9 = inlined_call_operand.vmem [shape: f32[16,128], index: 9, kind: output, shape index: {}]  }
   0x1   :  { %15 = vsyncpa [#allocation5], 0 }
   0x2   :  { %16 = vsyncpa [#allocation8], 0  ;;  %s38_s11 = sshll.u32 %s1620_s3, 4  ;;  %s1523_s12 = smov [#allocation4]   ;;  %s39_s11 = int_to_ptr.hbm [resolvable:$true] %s38_s11 }
   0x3   :  { %s40_s13 = sshll.u32 %s1523_s12, 4  ;;  %s23_s16 = sshll.u32 %s1618_s1, 4  ;;  %s41_s13 = int_to_ptr.vmem [resolvable:$true] %s40_s13  ;;  %s24_s16 = int_to_ptr.hbm [resolvable:$true] %s23_s16 }
   0x4   :  { %s1524_s17 = smov 128   ;;  %s1525_s18 = smov 8  }
   0x5   :  { %46 = dma.hbm_to_vmem [thread:$0]  %s39_s11, 4096, %s41_s13, [#allocation5], %s1524_s17, %s1524_s17, %s1525_s18  }
   0x6   :  { %s1526_s19 = smov [#allocation2]   ;;  %s53_s23 = sshll.u32 %s1622_s5, 4  ;;  %s54_s23 = int_to_ptr.hbm [resolvable:$true] %s53_s23 }
   0x7   :  { %s25_s20 = sshll.u32 %s1526_s19, 4  ;;  %s68_s25 = sshll.u32 %s1624_s7, 4  ;;  %s26_s20 = int_to_ptr.vmem [resolvable:$true] %s25_s20  ;;  %s69_s25 = int_to_ptr.hbm [resolvable:$true] %s68_s25 }
   0x8   :  { %31 = dma.hbm_to_vmem [thread:$0]  %s24_s16, 2048, %s26_s20, [#allocation3], %s1524_s17, %s1524_s17, %s1525_s18  }
   0x9   :  { %s1527_s26 = smov [#allocation6]   ;;  %s1528_s1 = smov [#allocation7]  }
   0xa   :  { %s55_s27 = sshll.u32 %s1527_s26, 4  ;;  %s70_s28 = sshll.u32 %s1528_s1, 4  ;;  %s56_s27 = int_to_ptr.vmem [resolvable:$true] %s55_s27  ;;  %s71_s28 = int_to_ptr.vmem [resolvable:$true] %s70_s28 }
   0xb   :  { %61 = dma.hbm_to_vmem [thread:$0]  %s54_s23, 4096, %s56_s27, [#allocation5], %s1524_s17, %s1524_s17, %s1525_s18  }
   0xc   :  { %s1529_s29 = smov 64   ;;  %s1530_s30 = smov 4  }
   0xd   :  { %76 = dma.hbm_to_vmem [thread:$0]  %s69_s25, 2048, %s71_s28, [#allocation8], %s1529_s29, %s1529_s29, %s1530_s30  }
   0xe   :  { %1517 = dma.done.wait [#allocation3], 2048  }
   0xf   :  { %1518 = vsyncadd [#allocation3], 4294965248 }
  0x10   :  { %1519 = dma.done.wait [#allocation5], 8192  }
  0x11   :  { %1520 = vsyncadd [#allocation5], 4294959104 }
  0x12   :  { %1521 = dma.done.wait [#allocation8], 2048  }
  0x13   :  { %1522 = vsyncadd [#allocation8], 4294965248  ;;  %v990_v0 = vld [vmem:[#allocation2 + $0x70] sm:$0xf]  ;;  %v1331_v1 = vld [vmem:[#allocation2 + $0x74] sm:$0xf0] }
  0x14   :  { %v1330_v2 = vld [vmem:[#allocation2 + $0x74] sm:$0xf]  ;;  %v991_v3 = vor.u32 %v1331_v1, %v990_v0  ;;  %v992_v4 = vld [vmem:[#allocation2 + $0x78] sm:$0xf0]  ;;  %v982_v5 = vld [vmem:[#allocation2 + $0x60] sm:$0xf] }
  0x15   :  { %v1329_v6 = vld [vmem:[#allocation2 + $0x64] sm:$0xf0]  ;;  %v995_v7 = vor.u32 %v1330_v2, %v992_v4  ;;  %v1328_v8 = vld [vmem:[#allocation2 + $0x64] sm:$0xf]  ;;  %v984_v9 = vld [vmem:[#allocation2 + $0x68] sm:$0xf0] }
  0x16   :  { %200 = vmatpush.bf16.msra.mxu0 %v991_v3  ;;  %v983_v10 = vor.u32 %v1329_v6, %v982_v5  ;;  %v987_v11 = vor.u32 %v1328_v8, %v984_v9  ;;  %v974_v12 = vld [vmem:[#allocation2 + $0x50] sm:$0xf]  ;;  %v1327_v13 = vld [vmem:[#allocation2 + $0x54] sm:$0xf0]  ;;  %v1326_v14 = vld [vmem:[#allocation2 + $0x54] sm:$0xf] }
  0x17   :  { %214 = vmatpush.bf16.msra.mxu1 %v995_v7  ;;  %v976_v15 = vld [vmem:[#allocation2 + $0x58] sm:$0xf0]  ;;  %v975_v16 = vor.u32 %v1327_v13, %v974_v12  ;;  %v966_v18 = vld [vmem:[#allocation2 + $0x40] sm:$0xf]  ;;  %v1325_v19 = vld [vmem:[#allocation2 + $0x44] sm:$0xf0] }
  0x18   :  { %v979_v17 = vor.u32 %v1326_v14, %v976_v15  ;;  %v1324_v20 = vld [vmem:[#allocation2 + $0x44] sm:$0xf]  ;;  %v968_v21 = vld [vmem:[#allocation2 + $0x48] sm:$0xf0]  ;;  %v967_v22 = vor.u32 %v1325_v19, %v966_v18  ;;  %v958_v23 = vld [vmem:[#allocation2 + $0x30] sm:$0xf] }
  0x19   :  { %v1054_v24 = vld [vmem:[#allocation4 + $0x70] sm:$0xf]  ;;  %v1347_v25 = vld [vmem:[#allocation4 + $0x74] sm:$0xf0]  ;;  %v971_v26 = vor.u32 %v1324_v20, %v968_v21  ;;  %v1322_v31 = vld [vmem:[#allocation2 + $0x34] sm:$0xf] }
  0x1a   :  { %201 = vmatpush.bf16.msra.mxu0 %v983_v10  ;;  %v1323_v27 = vld [vmem:[#allocation2 + $0x34] sm:$0xf0]  ;;  %v1055_v28 = vor.u32 %v1347_v25, %v1054_v24  ;;  %v1118_v29 = vld [vmem:[#allocation4 + $0xf0] sm:$0xf]  ;;  %v960_v32 = vld [vmem:[#allocation2 + $0x38] sm:$0xf0] }
  0x1b   :  { %215 = vmatpush.bf16.msra.mxu1 %v987_v11  ;;  %v1363_v30 = vld [vmem:[#allocation4 + $0xf4] sm:$0xf0]  ;;  %v1046_v34 = vld [vmem:[#allocation4 + $0x60] sm:$0xf]  ;;  %v1345_v35 = vld [vmem:[#allocation4 + $0x64] sm:$0xf0]  ;;  %v959_v37 = vor.u32 %v1323_v27, %v958_v23  ;;  %v963_v42 = vor.u32 %v1322_v31, %v960_v32 }
  0x1c   :  { %v1119_v33 = vor.u32 %v1363_v30, %v1118_v29  ;;  %432 = vmatpush.bf16.msra.mxu2 %v1055_v28  ;;  %v1110_v36 = vld [vmem:[#allocation4 + $0xe0] sm:$0xf]  ;;  %v1321_v39 = vld [vmem:[#allocation2 + $0x24] sm:$0xf0]  ;;  %v1047_v40 = vor.u32 %v1345_v35, %v1046_v34  ;;  %v1320_v43 = vld [vmem:[#allocation2 + $0x24] sm:$0xf] }
  0x1d   :  { %v950_v38 = vld [vmem:[#allocation2 + $0x20] sm:$0xf]  ;;  %v1361_v41 = vld [vmem:[#allocation4 + $0xe4] sm:$0xf0]  ;;  %v952_v44 = vld [vmem:[#allocation2 + $0x28] sm:$0xf0] }
  0x1e   :  { %202 = vmatpush.bf16.msra.mxu0 %v975_v16  ;;  %446 = vmatpush.bf16.msra.mxu3 %v1119_v33  ;;  %v1111_v45 = vor.u32 %v1361_v41, %v1110_v36  ;;  %v1038_v46 = vld [vmem:[#allocation4 + $0x50] sm:$0xf]  ;;  %v1343_v47 = vld [vmem:[#allocation4 + $0x54] sm:$0xf0]  ;;  %v951_v51 = vor.u32 %v1321_v39, %v950_v38  ;;  %v1030_v54 = vld [vmem:[#allocation4 + $0x40] sm:$0xf]  ;;  %v955_v56 = vor.u32 %v1320_v43, %v952_v44 }
  0x1f   :  { %216 = vmatpush.bf16.msra.mxu1 %v979_v17  ;;  %v1102_v48 = vld [vmem:[#allocation4 + $0xd0] sm:$0xf]  ;;  %v1359_v49 = vld [vmem:[#allocation4 + $0xd4] sm:$0xf0]  ;;  %v1039_v50 = vor.u32 %v1343_v47, %v1038_v46  ;;  %v1341_v55 = vld [vmem:[#allocation4 + $0x44] sm:$0xf0] }
  0x20   :  { %433 = vmatpush.bf16.msra.mxu2 %v1047_v40  ;;  %v942_v52 = vld [vmem:[#allocation2 + $0x10] sm:$0xf]  ;;  %v1103_v53 = vor.u32 %v1359_v49, %v1102_v48  ;;  %v1319_v57 = vld [vmem:[#allocation2 + $0x14] sm:$0xf0]  ;;  %v1094_v58 = vld [vmem:[#allocation4 + $0xc0] sm:$0xf]  ;;  %v1031_v62 = vor.u32 %v1341_v55, %v1030_v54 }
  0x21   :  { %v1357_v59 = vld [vmem:[#allocation4 + $0xc4] sm:$0xf0]  ;;  %v1318_v60 = vld [vmem:[#allocation2 + $0x14] sm:$0xf]  ;;  %v944_v61 = vld [vmem:[#allocation2 + $0x18] sm:$0xf0]  ;;  %v943_v63 = vor.u32 %v1319_v57, %v942_v52 }
  0x22   :  { %203 = vmatpush.bf16.msra.mxu0 %v967_v22  ;;  %447 = vmatpush.bf16.msra.mxu3 %v1111_v45  ;;  %v1095_v0 = vor.u32 %v1357_v59, %v1094_v58  ;;  %v947_v1 = vor.u32 %v1318_v60, %v944_v61  ;;  %v934_v2 = vld [vmem:[#allocation2] sm:$0xf]  ;;  %v1317_v3 = vld [vmem:[#allocation2 + $0x4] sm:$0xf0]  ;;  %v1316_v4 = vld [vmem:[#allocation2 + $0x4] sm:$0xf] }
  0x23   :  { %217 = vmatpush.bf16.msra.mxu1 %v971_v26  ;;  %v936_v5 = vld [vmem:[#allocation2 + $0x8] sm:$0xf0]  ;;  %v1346_v6 = vld [vmem:[#allocation4 + $0x74] sm:$0xf]  ;;  %v1056_v7 = vld [vmem:[#allocation4 + $0x78] sm:$0xf0]  ;;  %v935_v10 = vor.u32 %v1317_v3, %v934_v2 }
  0x24   :  { %434 = vmatpush.bf16.msra.mxu2 %v1039_v50  ;;  %v1362_v8 = vld [vmem:[#allocation4 + $0xf4] sm:$0xf]  ;;  %v1120_v9 = vld [vmem:[#allocation4 + $0xf8] sm:$0xf0]  ;;  %v95_v11 = vld [vmem:[%s1617_s0] sm:$0xff]  ;;  %v939_v13 = vor.u32 %v1316_v4, %v936_v5  ;;  %v1059_v14 = vor.u32 %v1346_v6, %v1056_v7 }
  0x25   :  { %v96_v12 = vld [vmem:[%s1617_s0 + $0x8] sm:$0xff]  ;;  %v1123_v15 = vor.u32 %v1362_v8, %v1120_v9  ;;  %v1344_v16 = vld [vmem:[#allocation4 + $0x64] sm:$0xf]  ;;  %v1342_v23 = vld [vmem:[#allocation4 + $0x54] sm:$0xf] }
  0x26   :  { %204 = vmatpush.bf16.msra.mxu0 %v959_v37  ;;  %448 = vmatpush.bf16.msra.mxu3 %v1103_v53  ;;  %v1048_v17 = vld [vmem:[#allocation4 + $0x68] sm:$0xf0]  ;;  %v97_v18 = vpack.c.bf16 %v96_v12, %v95_v11  ;;  %v1360_v19 = vld [vmem:[#allocation4 + $0xe4] sm:$0xf]  ;;  %v1040_v24 = vld [vmem:[#allocation4 + $0x58] sm:$0xf0] }
  0x27   :  { %218 = vmatpush.bf16.msra.mxu1 %v963_v42  ;;  %v1112_v20 = vld [vmem:[#allocation4 + $0xe8] sm:$0xf0]  ;;  %v1051_v21 = vor.u32 %v1344_v16, %v1048_v17  ;;  %v1358_v25 = vld [vmem:[#allocation4 + $0xd4] sm:$0xf]  ;;  %v1104_v26 = vld [vmem:[#allocation4 + $0xd8] sm:$0xf0]  ;;  %v1043_v27 = vor.u32 %v1342_v23, %v1040_v24 }
  0x28   :  { %435 = vmatpush.bf16.msra.mxu2 %v1031_v62  ;;  %v1115_v22 = vor.u32 %v1360_v19, %v1112_v20  ;;  %v1107_v28 = vor.u32 %v1358_v25, %v1104_v26  ;;  %v1340_v29 = vld [vmem:[#allocation4 + $0x44] sm:$0xf]  ;;  %v1032_v30 = vld [vmem:[#allocation4 + $0x48] sm:$0xf0]  ;;  %v1022_v35 = vld [vmem:[#allocation4 + $0x30] sm:$0xf] }
  0x29   :  { %v1356_v31 = vld [vmem:[#allocation4 + $0xc4] sm:$0xf]  ;;  %v1096_v32 = vld [vmem:[#allocation4 + $0xc8] sm:$0xf0]  ;;  %v1035_v33 = vor.u32 %v1340_v29, %v1032_v30  ;;  %v1339_v36 = vld [vmem:[#allocation4 + $0x34] sm:$0xf0] }
  0x2a   :  { %205 = vmatpush.bf16.msra.mxu0 %v951_v51  ;;  %449 = vmatpush.bf16.msra.mxu3 %v1095_v0  ;;  %v1099_v34 = vor.u32 %v1356_v31, %v1096_v32  ;;  %v1086_v37 = vld [vmem:[#allocation4 + $0xb0] sm:$0xf]  ;;  %v1023_v38 = vor.u32 %v1339_v36, %v1022_v35  ;;  %v1355_v39 = vld [vmem:[#allocation4 + $0xb4] sm:$0xf0]  ;;  %v1338_v40 = vld [vmem:[#allocation4 + $0x34] sm:$0xf] }
  0x2b   :  { %219 = vmatpush.bf16.msra.mxu1 %v955_v56  ;;  %v1024_v41 = vld [vmem:[#allocation4 + $0x38] sm:$0xf0]  ;;  %v1087_v42 = vor.u32 %v1355_v39, %v1086_v37  ;;  %v1354_v44 = vld [vmem:[#allocation4 + $0xb4] sm:$0xf]  ;;  %v1014_v47 = vld [vmem:[#allocation4 + $0x20] sm:$0xf] }
  0x2c   :  { %v1027_v43 = vor.u32 %v1338_v40, %v1024_v41  ;;  %v1088_v45 = vld [vmem:[#allocation4 + $0xb8] sm:$0xf0]  ;;  %436 = vmatpush.bf16.msra.mxu2 %v1023_v38  ;;  %v1337_v48 = vld [vmem:[#allocation4 + $0x24] sm:$0xf0]  ;;  %v1078_v50 = vld [vmem:[#allocation4 + $0xa0] sm:$0xf] }
  0x2d   :  { %v1091_v46 = vor.u32 %v1354_v44, %v1088_v45  ;;  %v1015_v49 = vor.u32 %v1337_v48, %v1014_v47  ;;  %v1353_v51 = vld [vmem:[#allocation4 + $0xa4] sm:$0xf0]  ;;  %v1336_v52 = vld [vmem:[#allocation4 + $0x24] sm:$0xf]  ;;  %v1016_v54 = vld [vmem:[#allocation4 + $0x28] sm:$0xf0] }
  0x2e   :  { %206 = vmatpush.bf16.msra.mxu0 %v943_v63  ;;  %450 = vmatpush.bf16.msra.mxu3 %v1087_v42  ;;  %v1079_v53 = vor.u32 %v1353_v51, %v1078_v50  ;;  %v1352_v55 = vld [vmem:[#allocation4 + $0xa4] sm:$0xf]  ;;  %v1080_v56 = vld [vmem:[#allocation4 + $0xa8] sm:$0xf0]  ;;  %v1019_v57 = vor.u32 %v1336_v52, %v1016_v54  ;;  %v1006_v59 = vld [vmem:[#allocation4 + $0x10] sm:$0xf] }
  0x2f   :  { %220 = vmatpush.bf16.msra.mxu1 %v947_v1  ;;  %v1083_v58 = vor.u32 %v1352_v55, %v1080_v56  ;;  %v1335_v60 = vld [vmem:[#allocation4 + $0x14] sm:$0xf0]  ;;  %v1070_v61 = vld [vmem:[#allocation4 + $0x90] sm:$0xf]  ;;  %v1334_v0 = vld [vmem:[#allocation4 + $0x14] sm:$0xf] }
  0x30   :  { %437 = vmatpush.bf16.msra.mxu2 %v1015_v49  ;;  %v1007_v62 = vor.u32 %v1335_v60, %v1006_v59  ;;  %v1351_v63 = vld [vmem:[#allocation4 + $0x94] sm:$0xf0]  ;;  %v1008_v1 = vld [vmem:[#allocation4 + $0x18] sm:$0xf0]  ;;  %v1350_v4 = vld [vmem:[#allocation4 + $0x94] sm:$0xf] }
  0x31   :  { %v1071_v2 = vor.u32 %v1351_v63, %v1070_v61  ;;  %v1011_v3 = vor.u32 %v1334_v0, %v1008_v1  ;;  %v1072_v5 = vld [vmem:[#allocation4 + $0x98] sm:$0xf0]  ;;  %v998_v7 = vld [vmem:[#allocation4] sm:$0xf]  ;;  %v1333_v8 = vld [vmem:[#allocation4 + $0x4] sm:$0xf0] }
  0x32   :  { %207 = vmatpush.bf16.msra.mxu0 %v935_v10  ;;  %451 = vmatpush.bf16.msra.mxu3 %v1079_v53  ;;  %v1075_v6 = vor.u32 %v1350_v4, %v1072_v5  ;;  %v1062_v9 = vld [vmem:[#allocation4 + $0x80] sm:$0xf]  ;;  %v999_v10 = vor.u32 %v1333_v8, %v998_v7  ;;  %v1349_v11 = vld [vmem:[#allocation4 + $0x84] sm:$0xf0]  ;;  %v1332_v12 = vld [vmem:[#allocation4 + $0x4] sm:$0xf] }
  0x33   :  { %221 = vmatpush.bf16.msra.mxu1 %v939_v13  ;;  %v1000_v13 = vld [vmem:[#allocation4 + $0x8] sm:$0xf0]  ;;  %v1348_v16 = vld [vmem:[#allocation4 + $0x84] sm:$0xf]  ;;  %v1246_v19 = vld [vmem:[#allocation6 + $0xf0] sm:$0xf] }
  0x34   :  { %438 = vmatpush.bf16.msra.mxu2 %v1007_v62  ;;  %v1064_v17 = vld [vmem:[#allocation4 + $0x88] sm:$0xf0]  ;;  %v1395_v20 = vld [vmem:[#allocation6 + $0xf4] sm:$0xf0]  ;;  %v1248_v23 = vld [vmem:[#allocation6 + $0xf8] sm:$0xf0] }
  0x35   :  { %208 = vmatmul.bf16.vlgmr.msra.gmra.mxu0 %v97_v18  ;;  %v1238_v24 = vld [vmem:[#allocation6 + $0xe0] sm:$0xf]  ;;  %v1393_v25 = vld [vmem:[#allocation6 + $0xe4] sm:$0xf0]  ;;  %v1182_v29 = vld [vmem:[#allocation6 + $0x70] sm:$0xf] }
  0x36   :  { %460 = vmatpush.bf16.msrb.mxu0 %v1059_v14  ;;  %222 = vmatmul.bf16.vlgmr.msra.gmra.mxu1 %v97_v18  ;;  %v1063_v14 = vor.u32 %v1349_v11, %v1062_v9  ;;  %v1067_v18 = vor.u32 %v1348_v16, %v1064_v17  ;;  %v1239_v30 = vor.u32 %v1393_v25, %v1238_v24  ;;  %v1379_v31 = vld [vmem:[#allocation6 + $0x74] sm:$0xf0]  ;;  %v1378_v32 = vld [vmem:[#allocation6 + $0x74] sm:$0xf]  ;;  %v1230_v37 = vld [vmem:[#allocation6 + $0xd0] sm:$0xf] }
  0x37   :  { %474 = vmatpush.bf16.msrb.mxu1 %v1123_v15  ;;  %452 = vmatpush.bf16.msra.mxu3 %v1071_v2  ;;  %v1003_v15 = vor.u32 %v1332_v12, %v1000_v13  ;;  %v1183_v35 = vor.u32 %v1379_v31, %v1182_v29  ;;  %v1391_v38 = vld [vmem:[#allocation6 + $0xd4] sm:$0xf0]  ;;  %v1390_v39 = vld [vmem:[#allocation6 + $0xd4] sm:$0xf]  ;;  %v1232_v40 = vld [vmem:[#allocation6 + $0xd8] sm:$0xf0] }
  0x38   :  { %439 = vmatpush.bf16.msra.mxu2 %v999_v10  ;;  %v1174_v41 = vld [vmem:[#allocation6 + $0x60] sm:$0xf]  ;;  %v1377_v42 = vld [vmem:[#allocation6 + $0x64] sm:$0xf0]  ;;  %v1376_v44 = vld [vmem:[#allocation6 + $0x64] sm:$0xf]  ;;  %v1235_v48 = vor.u32 %v1390_v39, %v1232_v40 }
  0x39   :  { %v1176_v45 = vld [vmem:[#allocation6 + $0x68] sm:$0xf0]  ;;  %v1222_v49 = vld [vmem:[#allocation6 + $0xc0] sm:$0xf]  ;;  %v1389_v50 = vld [vmem:[#allocation6 + $0xc4] sm:$0xf0] }
  0x3a   :  { %461 = vmatpush.bf16.msrb.mxu0 %v1051_v21  ;;  %v1394_v21 = vld [vmem:[#allocation6 + $0xf4] sm:$0xf]  ;;  %v1179_v47 = vor.u32 %v1376_v44, %v1176_v45  ;;  %v1388_v51 = vld [vmem:[#allocation6 + $0xc4] sm:$0xf]  ;;  %v1224_v52 = vld [vmem:[#allocation6 + $0xc8] sm:$0xf0]  ;;  %v1223_v53 = vor.u32 %v1389_v50, %v1222_v49 }
  0x3b   :  { %475 = vmatpush.bf16.msrb.mxu1 %v1115_v22  ;;  %453 = vmatpush.bf16.msra.mxu3 %v1063_v14  ;;  %v1247_v22 = vor.u32 %v1395_v20, %v1246_v19  ;;  %v1251_v26 = vor.u32 %v1394_v21, %v1248_v23  ;;  %v1227_v54 = vor.u32 %v1388_v51, %v1224_v52  ;;  %v114_v55 = vld [vmem:[%s1619_s2] sm:$0x3]  ;;  %v1166_v8 = vld [vmem:[#allocation6 + $0x50] sm:$0xf]  ;;  %v1375_v9 = vld [vmem:[#allocation6 + $0x54] sm:$0xf0] }
  0x3c   :  { %692 = vmatpush.bf16.msrb.mxu2 %v1183_v35  ;;  %v117_v59 = vperm.slane %v114_v55, 1  ;;  %v1374_v10 = vld [vmem:[#allocation6 + $0x54] sm:$0xf]  ;;  %v1167_v11 = vor.u32 %v1375_v9, %v1166_v8  ;;  %v1168_v12 = vld [vmem:[#allocation6 + $0x58] sm:$0xf0] }
  0x3d   :  { %v1171_v13 = vor.u32 %v1374_v10, %v1168_v12  ;;  %v1214_v14 = vld [vmem:[#allocation6 + $0xb0] sm:$0xf]  ;;  %v1386_v16 = vld [vmem:[#allocation6 + $0xb4] sm:$0xf]  ;;  %v1158_v20 = vld [vmem:[#allocation6 + $0x40] sm:$0xf] }
  0x3e   :  { %462 = vmatpush.bf16.msrb.mxu0 %v1043_v27  ;;  %v1392_v27 = vld [vmem:[#allocation6 + $0xe4] sm:$0xf]  ;;  %v1373_v21 = vld [vmem:[#allocation6 + $0x44] sm:$0xf0]  ;;  %v1160_v24 = vld [vmem:[#allocation6 + $0x48] sm:$0xf0] }
  0x3f   :  { %476 = vmatpush.bf16.msrb.mxu1 %v1107_v28  ;;  %v1240_v28 = vld [vmem:[#allocation6 + $0xe8] sm:$0xf0]  ;;  %706 = vmatpush.bf16.msrb.mxu3 %v1247_v22  ;;  %v1372_v22 = vld [vmem:[#allocation6 + $0x44] sm:$0xf]  ;;  %v1159_v23 = vor.u32 %v1373_v21, %v1158_v20  ;;  %v1383_v39 = vld [vmem:[#allocation6 + $0x94] sm:$0xf0] }
  0x40   :  { %v1163_v25 = vor.u32 %v1372_v22, %v1160_v24  ;;  %v1382_v40 = vld [vmem:[#allocation6 + $0x94] sm:$0xf]  ;;  %v1142_v44 = vld [vmem:[#allocation6 + $0x20] sm:$0xf]  ;;  %v1369_v45 = vld [vmem:[#allocation6 + $0x24] sm:$0xf0] }
  0x41   :  { %v1190_v50 = vld [vmem:[#allocation6 + $0x80] sm:$0xf]  ;;  %v1381_v51 = vld [vmem:[#allocation6 + $0x84] sm:$0xf0]  ;;  %v1380_v52 = vld [vmem:[#allocation6 + $0x84] sm:$0xf] }
  0x42   :  { %463 = vmatpush.bf16.msrb.mxu0 %v1035_v33  ;;  %v1184_v33 = vld [vmem:[#allocation6 + $0x78] sm:$0xf0] }
  0x43   :  { %477 = vmatpush.bf16.msrb.mxu1 %v1099_v34  ;;  %v1243_v34 = vor.u32 %v1392_v27, %v1240_v28  ;;  %v1187_v36 = vor.u32 %v1378_v32, %v1184_v33  ;;  %707 = vmatpush.bf16.msrb.mxu3 %v1239_v30  ;;  %v1385_v27 = vld [vmem:[#allocation6 + $0xa4] sm:$0xf0]  ;;  %v1384_v28 = vld [vmem:[#allocation6 + $0xa4] sm:$0xf]  ;;  %v1208_v30 = vld [vmem:[#allocation6 + $0xa8] sm:$0xf0] }
  0x44   :  { %v1211_v31 = vor.u32 %v1384_v28, %v1208_v30  ;;  %v1150_v32 = vld [vmem:[#allocation6 + $0x30] sm:$0xf]  ;;  %v1371_v33 = vld [vmem:[#allocation6 + $0x34] sm:$0xf0] }
  0x45   :  { %v1151_v35 = vor.u32 %v1371_v33, %v1150_v32  ;;  %v1409_v32 = vld [vmem:[#allocation7 + $0x68] sm:$0xff]  ;;  %v1402_v33 = vld [vmem:[#allocation7 + $0x30] sm:$0xff] }
  0x46   :  { %464 = vmatpush.bf16.msrb.mxu0 %v1027_v43  ;;  %v1175_v43 = vor.u32 %v1377_v42, %v1174_v41  ;;  %v1200_v42 = vld [vmem:[#allocation6 + $0x98] sm:$0xf0] }
  0x47   :  { %478 = vmatpush.bf16.msrb.mxu1 %v1091_v46  ;;  %v1231_v46 = vor.u32 %v1391_v38, %v1230_v37  ;;  %v1198_v38 = vld [vmem:[#allocation6 + $0x90] sm:$0xf] }
  0x48   :  { %693 = vmatpush.bf16.msrb.mxu2 %v1175_v43  ;;  %v1199_v41 = vor.u32 %v1383_v39, %v1198_v38  ;;  %v1203_v43 = vor.u32 %v1382_v40, %v1200_v42  ;;  %v1406_v38 = vld [vmem:[#allocation7 + $0x50] sm:$0xff]  ;;  %v1399_v39 = vld [vmem:[#allocation7 + $0x18] sm:$0xff]  ;;  %v1405_v40 = vld [vmem:[#allocation7 + $0x48] sm:$0xff] }
  0x49   :  { %708 = vmatpush.bf16.msrb.mxu3 %v1231_v46  ;;  %v1368_v46 = vld [vmem:[#allocation6 + $0x24] sm:$0xf] }
  0x4a   :  { %465 = vmatpush.bf16.msrb.mxu0 %v1019_v57  ;;  %v1404_v42 = vld [vmem:[#allocation7 + $0x40] sm:$0xff] }
  0x4b   :  { %479 = vmatpush.bf16.msrb.mxu1 %v1083_v58  ;;  %v116_v58 = vperm.slane %v114_v55, 0 }
  0x4c   :  { %694 = vmatpush.bf16.msrb.mxu2 %v1167_v11 }
  0x4d   :  { %709 = vmatpush.bf16.msrb.mxu3 %v1223_v53  ;;  %v1191_v53 = vor.u32 %v1381_v51, %v1190_v50 }
  0x4e   :  { %466 = vmatpush.bf16.msrb.mxu0 %v1011_v3 }
  0x4f   :  { %480 = vmatpush.bf16.msrb.mxu1 %v1075_v6 }
  0x50   :  { %695 = vmatpush.bf16.msrb.mxu2 %v1159_v23 }
  0x52   :  { %467 = vmatpush.bf16.msrb.mxu0 %v1003_v15  ;;  %v1387_v15 = vld [vmem:[#allocation6 + $0xb4] sm:$0xf0] }
  0x53   :  { %481 = vmatpush.bf16.msrb.mxu1 %v1067_v18  ;;  %v1215_v17 = vor.u32 %v1387_v15, %v1214_v14  ;;  %v1216_v18 = vld [vmem:[#allocation6 + $0xb8] sm:$0xf0] }
  0x54   :  { %v1219_v19 = vor.u32 %v1386_v16, %v1216_v18  ;;  %696 = vmatpush.bf16.msrb.mxu2 %v1151_v35  ;;  %v1401_v35 = vld [vmem:[#allocation7 + $0x28] sm:$0xff] }
  0x55   :  { %710 = vmatpush.bf16.msrb.mxu3 %v1215_v17 }
  0x56   :  { %720 = vmatpush.bf16.msra.mxu0 %v1187_v36  ;;  %v1152_v36 = vld [vmem:[#allocation6 + $0x38] sm:$0xf0] }
  0x57   :  { %734 = vmatpush.bf16.msra.mxu1 %v1251_v26  ;;  %v1206_v26 = vld [vmem:[#allocation6 + $0xa0] sm:$0xf] }
  0x58   :  { %v1207_v29 = vor.u32 %v1385_v27, %v1206_v26 }
  0x5a   :  { %721 = vmatpush.bf16.msra.mxu0 %v1179_v47  ;;  %711 = vmatpush.bf16.msrb.mxu3 %v1207_v29  ;;  %v1143_v47 = vor.u32 %v1369_v45, %v1142_v44  ;;  %v1396_v44 = vld [vmem:[#allocation7] sm:$0xff] }
  0x5b   :  { %735 = vmatpush.bf16.msra.mxu1 %v1243_v34  ;;  %v1370_v34 = vld [vmem:[#allocation6 + $0x34] sm:$0xf]  ;;  %v526_v45 = vld [vmem:[%s1623_s6] sm:$0x3] }
  0x5c   :  { %v1155_v37 = vor.u32 %v1370_v34, %v1152_v36  ;;  %697 = vmatpush.bf16.msrb.mxu2 %v1143_v47  ;;  %v1408_v34 = vld [vmem:[#allocation7 + $0x60] sm:$0xff]  ;;  %v1407_v36 = vld [vmem:[#allocation7 + $0x58] sm:$0xff] }
  0x5e   :  { %722 = vmatpush.bf16.msra.mxu0 %v1171_v13  ;;  %712 = vmatpush.bf16.msrb.mxu3 %v1199_v41  ;;  %v1398_v41 = vld [vmem:[#allocation7 + $0x10] sm:$0xff] }
  0x5f   :  { %736 = vmatpush.bf16.msra.mxu1 %v1235_v48  ;;  %v1144_v48 = vld [vmem:[#allocation6 + $0x28] sm:$0xf0] }
  0x60   :  { %v1147_v49 = vor.u32 %v1368_v46, %v1144_v48  ;;  %v529_v48 = vperm.slane %v526_v45, 1 }
  0x62   :  { %723 = vmatpush.bf16.msra.mxu0 %v1163_v25  ;;  %713 = vmatpush.bf16.msrb.mxu3 %v1191_v53 }
  0x63   :  { %737 = vmatpush.bf16.msra.mxu1 %v1227_v54  ;;  %v1192_v54 = vld [vmem:[#allocation6 + $0x88] sm:$0xf0] }
  0x64   :  { %v1195_v55 = vor.u32 %v1380_v52, %v1192_v54  ;;  %v528_v52 = vperm.slane %v526_v45, 0 }
  0x66   :  { %724 = vmatpush.bf16.msra.mxu0 %v1155_v37  ;;  %v1400_v37 = vld [vmem:[#allocation7 + $0x20] sm:$0xff] }
  0x67   :  { %738 = vmatpush.bf16.msra.mxu1 %v1219_v19 }
  0x6a   :  { %725 = vmatpush.bf16.msra.mxu0 %v1147_v49 }
  0x6b   :  { %739 = vmatpush.bf16.msra.mxu1 %v1211_v31 }
  0x6f   :  { %740 = vmatpush.bf16.msra.mxu1 %v1203_v43  ;;  %v1397_v43 = vld [vmem:[#allocation7 + $0x8] sm:$0xff] }
  0x73   :  { %741 = vmatpush.bf16.msra.mxu1 %v1195_v55 }
  0xb2   :  { %v209_v56 = vpop.f32.mrf.mxu0 }
  0xb3   :  { %v223_v57 = vpop.f32.mrf.mxu1  ;;  %v210_v60 = vadd.f32 %v209_v56, %v116_v58  ;;  %v1134_v56 = vld [vmem:[#allocation6 + $0x10] sm:$0xf] }
  0xb4   :  { %v224_v61 = vadd.f32 %v223_v57, %v117_v59  ;;  %v1367_v57 = vld [vmem:[#allocation6 + $0x14] sm:$0xf0] }
  0xb5   :  { %v228_v2 = vmax.f32 %v210_v60, 0.0  ;;  %v1136_v60 = vld [vmem:[#allocation6 + $0x18] sm:$0xf0] }
  0xb6   :  { %v229_v4 = vmax.f32 %v224_v61, 0.0 }
  0xba   :  { %v211_v62 = vpop.f32.mrf.mxu0 }
  0xbb   :  { %v212_v63 = vadd.f32 %v211_v62, %v116_v58  ;;  %v225_v0 = vpop.f32.mrf.mxu1  ;;  %v1366_v58 = vld [vmem:[#allocation6 + $0x14] sm:$0xf]  ;;  %v1126_v62 = vld [vmem:[#allocation6] sm:$0xf] }
  0xbc   :  { %v226_v1 = vadd.f32 %v225_v0, %v117_v59  ;;  %v1135_v59 = vor.u32 %v1367_v57, %v1134_v56  ;;  %v1139_v61 = vor.u32 %v1366_v58, %v1136_v60  ;;  %v1364_v0 = vld [vmem:[#allocation6 + $0x4] sm:$0xf] }
  0xbd   :  { %v230_v3 = vmax.f32 %v212_v63, 0.0  ;;  %v1365_v63 = vld [vmem:[#allocation6 + $0x4] sm:$0xf0] }
  0xbe   :  { %v231_v5 = vmax.f32 %v226_v1, 0.0  ;;  %698 = vmatpush.bf16.msrb.mxu2 %v1135_v59  ;;  %726 = vmatpush.bf16.msra.mxu0 %v1139_v61  ;;  %v1127_v1 = vor.u32 %v1365_v63, %v1126_v62 }
  0xbf   :  { %v232_v6 = vpack.c.bf16 %v230_v3, %v228_v2  ;;  %v1128_v2 = vld [vmem:[#allocation6 + $0x8] sm:$0xf0] }
  0xc0   :  { %v233_v7 = vpack.c.bf16 %v231_v5, %v229_v4  ;;  %v1131_v3 = vor.u32 %v1364_v0, %v1128_v2  ;;  %v1411_v4 = vld [vmem:[#allocation7 + $0x78] sm:$0xff] }
  0xc1   :  { %440 = vmatmul.bf16.vlgmr.msra.gmra.mxu2 %v232_v6  ;;  %468 = vmatmul.bf16.vlgmr.msrb.gmra.mxu0 %v232_v6  ;;  %v1403_v5 = vld [vmem:[#allocation7 + $0x38] sm:$0xff]  ;;  %v1410_v6 = vld [vmem:[#allocation7 + $0x70] sm:$0xff] }
  0xc2   :  { %454 = vmatmul.bf16.vlgmr.msra.gmra.mxu3 %v233_v7  ;;  %482 = vmatmul.bf16.vlgmr.msrb.gmra.mxu1 %v233_v7  ;;  %v266_v7 = vld [vmem:[%s1621_s4] sm:$0x3] }
  0xc3   :  { %699 = vmatpush.bf16.msrb.mxu2 %v1127_v1  ;;  %727 = vmatpush.bf16.msra.mxu0 %v1131_v3  ;;  %v269_v9 = vperm.slane %v266_v7, 1  ;;  %v268_v13 = vperm.slane %v266_v7, 0  ;;  %v914_v7 = vlaneseq }
  0xc4   :  { %900 = vmatpush.bf16.msra.mxu3 %v1411_v4 }
  0xc7   :  { %886 = vmatpush.bf16.msra.mxu2 %v1403_v5 }
  0xc8   :  { %901 = vmatpush.bf16.msra.mxu3 %v1410_v6  ;;  %v1420_v6 = vld [vmem:[%s1625_s8] ss:$0 sm:$0xff] }
  0xcb   :  { %887 = vmatpush.bf16.msra.mxu2 %v1402_v33 }
  0xcc   :  { %902 = vmatpush.bf16.msra.mxu3 %v1409_v32 }
  0xcf   :  { %888 = vmatpush.bf16.msra.mxu2 %v1401_v35 }
  0xd0   :  { %903 = vmatpush.bf16.msra.mxu3 %v1408_v34 }
  0xd3   :  { %889 = vmatpush.bf16.msra.mxu2 %v1400_v37 }
  0xd4   :  { %904 = vmatpush.bf16.msra.mxu3 %v1407_v36 }
  0xd7   :  { %890 = vmatpush.bf16.msra.mxu2 %v1399_v39 }
  0xd8   :  { %905 = vmatpush.bf16.msra.mxu3 %v1406_v38 }
  0xdb   :  { %891 = vmatpush.bf16.msra.mxu2 %v1398_v41 }
  0xdc   :  { %906 = vmatpush.bf16.msra.mxu3 %v1405_v40 }
  0xdf   :  { %892 = vmatpush.bf16.msra.mxu2 %v1397_v43 }
  0xe0   :  { %907 = vmatpush.bf16.msra.mxu3 %v1404_v42 }
  0xe3   :  { %893 = vmatpush.bf16.msra.mxu2 %v1396_v44 }
 0x13e   :  { %v469_v8 = vpop.f32.mrf.mxu0 }
 0x13f   :  { %v483_v10 = vpop.f32.mrf.mxu1  ;;  %v470_v11 = vadd.f32 %v469_v8, %v269_v9 }
 0x141   :  { %v484_v16 = vadd.f32 %v483_v10, %v470_v11  ;;  %v915_v11 = vand.u32 127, %v914_v7 }
 0x143   :  { %v489_v21 = vmax.f32 %v484_v16, 0.0  ;;  %vm916_vm0 = vcmp.ge.s32.totalorder %v915_v11, 8 }
 0x144   :  { %v441_v12 = vpop.f32.mrf.mxu2 }
 0x145   :  { %v455_v14 = vpop.f32.mrf.mxu3  ;;  %v442_v19 = vadd.f32 %v441_v12, %v268_v13 }
 0x146   :  { %v471_v15 = vpop.f32.mrf.mxu0 }
 0x147   :  { %v472_v17 = vadd.f32 %v471_v15, %v269_v9  ;;  %v485_v18 = vpop.f32.mrf.mxu1  ;;  %v456_v24 = vadd.f32 %v455_v14, %v442_v19 }
 0x149   :  { %v486_v20 = vadd.f32 %v485_v18, %v472_v17  ;;  %v488_v29 = vmax.f32 %v456_v24, 0.0 }
 0x14b   :  { %v491_v22 = vmax.f32 %v486_v20, 0.0 }
 0x14c   :  { %v443_v23 = vpop.f32.mrf.mxu2 }
 0x14d   :  { %v493_v25 = vpack.c.bf16 %v491_v22, %v489_v21  ;;  %v444_v26 = vadd.f32 %v443_v23, %v268_v13  ;;  %v457_v27 = vpop.f32.mrf.mxu3 }
 0x14f   :  { %v458_v28 = vadd.f32 %v457_v27, %v444_v26  ;;  %714 = vmatmul.bf16.vlgmr.msrb.gmra.mxu3 %v493_v25  ;;  %742 = vmatmul.bf16.vlgmr.msra.gmra.mxu1 %v493_v25 }
 0x151   :  { %v490_v30 = vmax.f32 %v458_v28, 0.0 }
 0x153   :  { %v492_v31 = vpack.c.bf16 %v490_v30, %v488_v29 }
 0x155   :  { %700 = vmatmul.bf16.vlgmr.msrb.gmra.mxu2 %v492_v31  ;;  %728 = vmatmul.bf16.vlgmr.msra.gmra.mxu0 %v492_v31 }
 0x1cc   :  { %v743_v46 = vpop.f32.mrf.mxu1 }
 0x1d2   :  { %v729_v47 = vpop.f32.mrf.mxu0  ;;  %v715_v50 = vpop.f32.mrf.mxu3 }
 0x1d3   :  { %v730_v49 = vadd.f32 %v729_v47, %v529_v48 }
 0x1d4   :  { %v745_v56 = vpop.f32.mrf.mxu1 }
 0x1d5   :  { %v744_v54 = vadd.f32 %v743_v46, %v730_v49 }
 0x1d7   :  { %v749_v59 = vmax.f32 %v744_v54, 0.0 }
 0x1d8   :  { %v701_v51 = vpop.f32.mrf.mxu2 }
 0x1d9   :  { %v702_v57 = vadd.f32 %v701_v51, %v528_v52 }
 0x1da   :  { %v731_v53 = vpop.f32.mrf.mxu0  ;;  %v717_v1 = vpop.f32.mrf.mxu3 }
 0x1db   :  { %v732_v55 = vadd.f32 %v731_v53, %v529_v48  ;;  %v716_v62 = vadd.f32 %v715_v50, %v702_v57 }
 0x1dd   :  { %v746_v58 = vadd.f32 %v745_v56, %v732_v55  ;;  %v748_v3 = vmax.f32 %v716_v62, 0.0 }
 0x1df   :  { %v751_v60 = vmax.f32 %v746_v58, 0.0 }
 0x1e0   :  { %v703_v61 = vpop.f32.mrf.mxu2 }
 0x1e1   :  { %v753_v63 = vpack.c.bf16 %v751_v60, %v749_v59  ;;  %v704_v0 = vadd.f32 %v703_v61, %v528_v52 }
 0x1e3   :  { %v718_v2 = vadd.f32 %v717_v1, %v704_v0  ;;  %908 = vmatmul.bf16.vlgmr.msra.gmra.mxu3 %v753_v63 }
 0x1e5   :  { %v750_v4 = vmax.f32 %v718_v2, 0.0 }
 0x1e7   :  { %v752_v5 = vpack.c.bf16 %v750_v4, %v748_v3 }
 0x1e9   :  { %894 = vmatmul.bf16.vlgmr.msra.gmra.mxu2 %v752_v5 }
 0x266   :  { %v909_v8 = vpop.f32.mrf.mxu3 }
 0x26c   :  { %v895_v9 = vpop.f32.mrf.mxu2 }
 0x26d   :  { %v896_v10 = vadd.f32 %v1420_v6, %v895_v9 }
 0x26e   :  { %v911_v18 = vpop.f32.mrf.mxu3 }
 0x26f   :  { %v910_v12 = vadd.f32 %v909_v8, %v896_v10 }
 0x271   :  { %v917_v13 = vmax.f32 %v910_v12, -20.0 }
 0x273   :  { %v919_v14 = vmin.f32 %v917_v13, 2.0 }
 0x274   :  { %v897_v15 = vpop.f32.mrf.mxu2 }
 0x275   :  { %v921_v16 = vsel %vm916_vm0, %v919_v14, %v910_v12  ;;  %v898_v17 = vadd.f32 %v1420_v6, %v897_v15 }
 0x276   :  { %923 = vst [vmem:[%s1626_s9] sm:$0xff] %v921_v16 }
 0x277   :  { %v912_v19 = vadd.f32 %v911_v18, %v898_v17 }
 0x279   :  { %v918_v20 = vmax.f32 %v912_v19, -20.0 }
 0x27b   :  { %v920_v21 = vmin.f32 %v918_v20, 2.0 }
 0x27d   :  { %v922_v22 = vsel %vm916_vm0, %v920_v21, %v912_v19 }
 0x27e   :  { %924 = vst [vmem:[%s1626_s9 + $0x8] sm:$0xff] %v922_v22 }
 0x27f   :  { %929 = vsyncpa [#allocation3], 1 }
 0x280   :  { %930 = vsyncpa [#allocation5], 1 }
 0x281   :  { %931 = vsyncpa [#allocation8], 1 }

</bundles_post_ra>
